<compile_context>
chip_gen: v7x
topology: tpu7x:2x2x1
jax: 0.10.0
libtpu: 0.0.40
codegen_flags: <defaults>
</compile_context>

<pallas_src>
import jax
import jax.numpy as jnp
from jax.experimental import pallas as pl
from jax.experimental.pallas import tpu as pltpu


# ---------------------------------------------------------------------------
# Kernels
# ---------------------------------------------------------------------------

def _ffn_kernel_resident(x_ref, w1_ref, b1_ref, w2_ref, b2_ref, o_ref):
    """Weights fully resident in VMEM; grid = (M tiles,)."""
    h = jnp.dot(x_ref[...], w1_ref[...], preferred_element_type=jnp.float32)
    h = jnp.maximum(h + b1_ref[...], 0.0)
    y = jnp.dot(h.astype(w2_ref.dtype), w2_ref[...],
                preferred_element_type=jnp.float32)
    # Dropout (eval) == identity.
    o_ref[...] = (y + b2_ref[...]).astype(o_ref.dtype)


def _ffn_kernel_streamed(x_ref, w1_ref, b1_ref, w2_ref, b2_ref, o_ref, acc_ref):
    """H streamed as an inner reduction; grid = (M tiles, H tiles)."""
    k = pl.program_id(1)

    h = jnp.dot(x_ref[...], w1_ref[...], preferred_element_type=jnp.float32)
    h = jnp.maximum(h + b1_ref[...], 0.0)
    contrib = jnp.dot(h.astype(w2_ref.dtype), w2_ref[...],
                      preferred_element_type=jnp.float32)

    # Init elision: fold b2 into the first chunk's write (no zero-init store).
    @pl.when(k == 0)
    def _():
        acc_ref[...] = contrib + b2_ref[...]

    @pl.when(k > 0)
    def _():
        acc_ref[...] += contrib

    @pl.when(k == pl.num_programs(1) - 1)
    def _():
        # Dropout (eval) == identity.
        o_ref[...] = acc_ref[...].astype(o_ref.dtype)


# ---------------------------------------------------------------------------
# Trace-time tile planning (generation aware)
# ---------------------------------------------------------------------------

def _round_up(x, m):
    return ((x + m - 1) // m) * m


def _device_vmem_and_kind():
    try:
        kind = jax.devices()[0].device_kind.lower()
    except Exception:
        kind = ""
    vmem_cap = None
    try:
        vmem_cap = int(pltpu.get_tpu_info().vmem_capacity_bytes)
    except Exception:
        vmem_cap = None
    if vmem_cap is None or vmem_cap <= 0:
        # v5e/v6e: 128 MiB; v7x (and unknown): conservative 64 MiB per core.
        if ("v5" in kind) or ("v6" in kind):
            vmem_cap = 128 << 20
        else:
            vmem_cap = 64 << 20
    return vmem_cap, kind


def _choose_block_h(Hp, target):
    """Largest multiple-of-128 divisor of Hp that is <= target (Hp % 128 == 0)."""
    bh = max(128, (min(target, Hp) // 128) * 128)
    while Hp % bh != 0:
        bh -= 128
    return bh


def _bm_candidates(M, target_m, align, want_two_tiles):
    """Row-tile candidates, in descending preference order."""
    cands = []
    if M <= target_m:
        if want_two_tiles and M > align:
            # Split rows so both v7x TensorCores get a grid step.
            half = _round_up(-(-M // 2), 8)
            if 0 < half < M:
                cands.append(half)
        cands.append(M)                       # full-M tile is always legal
    bm = (min(target_m, M) // align) * align
    while bm >= align:
        if bm not in cands:
            cands.append(bm)
        bm -= align
    if not cands:
        cands = [M]
    return cands


def _plan(M, Cp, Hp, x_isz, w_isz):
    vmem_cap, kind = _device_vmem_and_kind()
    budget = int(vmem_cap * 0.85)             # headroom for compiler scratch
    is_v7 = ("tpu7" in kind) or ("v7" in kind)
    is_v6 = "v6" in kind
    align = 256 if (is_v6 or is_v7) else 128  # MXU: 2x256^2 (v6e/v7x), 4x128^2 (v5e)
    target_m = 1024 if is_v6 else 512

    def resident_bytes(bm):
        return (4 * bm * Cp * x_isz               # x in + out (double buffered)
                + 4 * Cp * Hp * w_isz             # W1 + W2 (2 buffers each)
                + 2 * (Hp + Cp) * w_isz           # biases
                + bm * Hp * (4 + w_isz))          # h intermediate (f32 + cast)

    def streamed_bytes(bm, bh):
        return (4 * bm * Cp * x_isz               # x in + out (double buffered)
                + 4 * Cp * bh * w_isz             # W1/W2 chunks (2 buffers each)
                + 2 * (bh + Cp) * w_isz           # biases
                + bm * Cp * 4                     # f32 accumulator scratch
                + bm * bh * (4 + w_isz))          # h intermediate (f32 + cast)

    cands = _bm_candidates(M, target_m, align, want_two_tiles=is_v7)

    # Weight-resident fast path.
    for bm in cands:
        if resident_bytes(bm) <= budget:
            return "resident", bm, Hp, budget

    # Streamed path: shrink block_h (divisors of Hp) until a row tile fits.
    bh = _choose_block_h(Hp, 512)
    while True:
        for bm in cands:
            if streamed_bytes(bm, bh) <= budget:
                return "streamed", bm, bh, budget
        if bh <= 128:
            break
        bh = _choose_block_h(Hp, bh - 128)
    return "streamed", cands[-1], _choose_block_h(Hp, 128), budget


# ---------------------------------------------------------------------------
# Wrapper
# ---------------------------------------------------------------------------

@jax.jit
def ffn_forward(x, w1, b1, w2, b2):
    """x: (B, T, C).  w1: (C, H), b1: (H,), w2: (H, C), b2: (C,)  — (in, out)."""
    B, T, C = x.shape
    H = w1.shape[1]
    M = B * T

    Cp = _round_up(C, 128)
    Hp = _round_up(H, 128)
    pad_c, pad_h = Cp - C, Hp - H

    xf = x.reshape(M, C)
    if pad_c or pad_h:
        # Zero padding is exact: padded x cols / W1 rows / W1 cols / b1 / W2
        # rows / W2 cols / b2 all contribute exactly 0 through matmul + ReLU.
        xf = jnp.pad(xf, ((0, 0), (0, pad_c)))
        w1 = jnp.pad(w1, ((0, pad_c), (0, pad_h)))
        b1 = jnp.pad(b1, ((0, pad_h),))
        w2 = jnp.pad(w2, ((0, pad_h), (0, pad_c)))
        b2 = jnp.pad(b2, ((0, pad_c),))
    b1_2d = b1.reshape(1, Hp)
    b2_2d = b2.reshape(1, Cp)

    x_isz = jnp.dtype(x.dtype).itemsize
    w_isz = jnp.dtype(w1.dtype).itemsize
    mode, bm, bh, budget = _plan(M, Cp, Hp, x_isz, w_isz)

    if mode == "resident":
        grid = (pl.cdiv(M, bm),)
        in_specs = [
            pl.BlockSpec((bm, Cp), lambda i: (i, 0)),   # x rows
            pl.BlockSpec((Cp, Hp), lambda i: (0, 0)),   # W1 (resident)
            pl.BlockSpec((1, Hp), lambda i: (0, 0)),    # b1 (resident)
            pl.BlockSpec((Hp, Cp), lambda i: (0, 0)),   # W2 (resident)
            pl.BlockSpec((1, Cp), lambda i: (0, 0)),    # b2 (resident)
        ]
        out_specs = pl.BlockSpec((bm, Cp), lambda i: (i, 0))
        scratch = []
        kernel = _ffn_kernel_resident
        dim_sem = ("parallel",)
        weight_reads = 1
    else:
        grid = (pl.cdiv(M, bm), Hp // bh)
        in_specs = [
            pl.BlockSpec((bm, Cp), lambda i, k: (i, 0)),   # x rows (const over k)
            pl.BlockSpec((Cp, bh), lambda i, k: (0, k)),   # W1 chunk
            pl.BlockSpec((1, bh), lambda i, k: (0, k)),    # b1 chunk
            pl.BlockSpec((bh, Cp), lambda i, k: (k, 0)),   # W2 chunk
            pl.BlockSpec((1, Cp), lambda i, k: (0, 0)),    # b2
        ]
        out_specs = pl.BlockSpec((bm, Cp), lambda i, k: (i, 0))
        scratch = [pltpu.VMEM((bm, Cp), jnp.float32)]
        kernel = _ffn_kernel_streamed
        dim_sem = ("parallel", "arbitrary")
        weight_reads = grid[0]                  # weights re-streamed per M tile

    cost = pl.CostEstimate(
        flops=4 * M * Cp * Hp,                  # two matmuls
        transcendentals=0,
        bytes_accessed=(2 * M * Cp * x_isz                       # x read + out write
                        + weight_reads * (2 * Cp * Hp + Hp + Cp) * w_isz),
    )

    out = pl.pallas_call(
        kernel,
        out_shape=jax.ShapeDtypeStruct((M, Cp), x.dtype),
        grid_spec=pltpu.PrefetchScalarGridSpec(
            num_scalar_prefetch=0,
            grid=grid,
            in_specs=in_specs,
            out_specs=out_specs,
            scratch_shapes=scratch,
        ),
        compiler_params=pltpu.CompilerParams(
            dimension_semantics=dim_sem,
            vmem_limit_bytes=max(32 << 20, budget),
        ),
        cost_estimate=cost,
    )(xf, w1, b1_2d, w2, b2_2d)

    if pad_c:
        out = out[:, :C]
    return out.reshape(B, T, C)


def init_ffn_params(key, n_embedding, factor=4, dtype=jnp.float32):
    """Deterministic init matching nn.Linear shapes (stored as (in, out))."""
    H = n_embedding * factor
    k1, k2, k3, k4 = jax.random.split(key, 4)
    bound1 = 1.0 / jnp.sqrt(n_embedding)
    bound2 = 1.0 / jnp.sqrt(H)
    w1 = jax.random.uniform(k1, (n_embedding, H), dtype, -bound1, bound1)
    b1 = jax.random.uniform(k2, (H,), dtype, -bound1, bound1)
    w2 = jax.random.uniform(k3, (H, n_embedding), dtype, -bound2, bound2)
    b2 = jax.random.uniform(k4, (n_embedding,), dtype, -bound2, bound2)
    return w1, b1, w2, b2


if __name__ == "__main__":
    # Small shapes implied by the module: token embeddings (B, T, C).
    B, T, C = 2, 8, 32          # n_embedding = 32, factor = 4 -> hidden = 128
    key = jax.random.PRNGKey(0)
    kx, kp = jax.random.split(key)

    # f32 here so the correctness check is tight; the kernel is dtype-agnostic
    # (pass bf16 x/weights in production for full MXU throughput).
    x = jax.random.normal(kx, (B, T, C), dtype=jnp.float32)
    w1, b1, w2, b2 = init_ffn_params(kp, C, factor=4)

    y = ffn_forward(x, w1, b1, w2, b2)
    jax.block_until_ready(y)

    # Sanity check against plain-JAX reference (same math as the PyTorch module,
    # dropout in eval mode == identity).
    y_ref = jnp.maximum(x.reshape(-1, C) @ w1 + b1, 0.0) @ w2 + b2
    y_ref = y_ref.reshape(B, T, C)
    assert jnp.allclose(y, y_ref, atol=1e-5, rtol=1e-5), (
        float(jnp.max(jnp.abs(y - y_ref))))

    print("KERNEL_OK")
</pallas_src>

<mosaic_0001>
module attributes {stable_mosaic.version = 11 : i64} {
  func.func @_ffn_kernel_resident(%arg0: i32, %arg1: memref<16x128xf32, #tpu.memory_space<vmem>>, %arg2: memref<128x128xf32, #tpu.memory_space<vmem>>, %arg3: memref<1x128xf32, #tpu.memory_space<vmem>>, %arg4: memref<128x128xf32, #tpu.memory_space<vmem>>, %arg5: memref<1x128xf32, #tpu.memory_space<vmem>>, %arg6: memref<16x128xf32, #tpu.memory_space<vmem>>) attributes {dimension_semantics = [#tpu.dimension_semantics<parallel>], iteration_bounds = array<i64: 1>, scalar_prefetch = 0 : i64, scratch_operands = 0 : i64, tpu.core_type = #tpu.core_type<tc>, window_params = [{transform_indices = @transform_0, window_bounds = array<i64: 16, 128>}, {pipeline_mode = #tpu.pipeline_mode<synchronous>, transform_indices = @transform_1, window_bounds = array<i64: 128, 128>}, {pipeline_mode = #tpu.pipeline_mode<synchronous>, transform_indices = @transform_2, window_bounds = array<i64: 1, 128>}, {pipeline_mode = #tpu.pipeline_mode<synchronous>, transform_indices = @transform_3, window_bounds = array<i64: 128, 128>}, {pipeline_mode = #tpu.pipeline_mode<synchronous>, transform_indices = @transform_4, window_bounds = array<i64: 1, 128>}, {transform_indices = @transform_5, window_bounds = array<i64: 16, 128>}]} {
    %c0 = arith.constant 0 : index
    %c0_0 = arith.constant 0 : index
    %0 = vector.load %arg1[%c0, %c0_0] : memref<16x128xf32, #tpu.memory_space<vmem>>, vector<16x128xf32>
    %c0_1 = arith.constant 0 : index
    %c0_2 = arith.constant 0 : index
    %1 = vector.load %arg2[%c0_1, %c0_2] : memref<128x128xf32, #tpu.memory_space<vmem>>, vector<128x128xf32>
    %cst = arith.constant dense<0.000000e+00> : vector<16x128xf32>
    %2 = tpu.matmul %0, %1, %cst {dimension_numbers = #tpu.dot_dimension_numbers<[1], [0], [0], [1], [0, 0, 1, 1], [], []>} : vector<16x128xf32>, vector<128x128xf32>, vector<16x128xf32> -> vector<16x128xf32>
    %c0_3 = arith.constant 0 : index
    %c0_4 = arith.constant 0 : index
    %3 = vector.load %arg3[%c0_3, %c0_4] : memref<1x128xf32, #tpu.memory_space<vmem>>, vector<1x128xf32>
    %4 = vector.broadcast %3 : vector<1x128xf32> to vector<16x128xf32>
    %5 = arith.addf %2, %4 : vector<16x128xf32>
    %cst_5 = arith.constant 0.000000e+00 : f32
    %6 = vector.broadcast %cst_5 : f32 to vector<16x128xf32>
    %7 = arith.maximumf %5, %6 : vector<16x128xf32>
    %c0_6 = arith.constant 0 : index
    %c0_7 = arith.constant 0 : index
    %8 = vector.load %arg4[%c0_6, %c0_7] : memref<128x128xf32, #tpu.memory_space<vmem>>, vector<128x128xf32>
    %cst_8 = arith.constant dense<0.000000e+00> : vector<16x128xf32>
    %9 = tpu.matmul %7, %8, %cst_8 {dimension_numbers = #tpu.dot_dimension_numbers<[1], [0], [0], [1], [0, 0, 1, 1], [], []>} : vector<16x128xf32>, vector<128x128xf32>, vector<16x128xf32> -> vector<16x128xf32>
    %c0_9 = arith.constant 0 : index
    %c0_10 = arith.constant 0 : index
    %10 = vector.load %arg5[%c0_9, %c0_10] : memref<1x128xf32, #tpu.memory_space<vmem>>, vector<1x128xf32>
    %11 = vector.broadcast %10 : vector<1x128xf32> to vector<16x128xf32>
    %12 = arith.addf %9, %11 : vector<16x128xf32>
    %c0_11 = arith.constant 0 : index
    %c0_12 = arith.constant 0 : index
    %13 = vector.load %arg6[%c0_11, %c0_12] : memref<16x128xf32, #tpu.memory_space<vmem>>, vector<16x128xf32>
    tpu.vector_store %arg6[%c0_11, %c0_12], %12 {strides = array<i32>} : memref<16x128xf32, #tpu.memory_space<vmem>>, vector<16x128xf32>,
    return
  }
  func.func @transform_0(%arg0: i32) -> (i32, i32) {
    %c0_i32 = arith.constant 0 : i32
    %c0_i32_0 = arith.constant 0 : i32
    return %arg0, %c0_i32 : i32, i32
  }
  func.func @transform_1(%arg0: i32) -> (i32, i32) {
    %c0_i32 = arith.constant 0 : i32
    %c0_i32_0 = arith.constant 0 : i32
    %c0_i32_1 = arith.constant 0 : i32
    return %c0_i32, %c0_i32_0 : i32, i32
  }
  func.func @transform_2(%arg0: i32) -> (i32, i32) {
    %c0_i32 = arith.constant 0 : i32
    %c0_i32_0 = arith.constant 0 : i32
    %c0_i32_1 = arith.constant 0 : i32
    return %c0_i32, %c0_i32_0 : i32, i32
  }
  func.func @transform_3(%arg0: i32) -> (i32, i32) {
    %c0_i32 = arith.constant 0 : i32
    %c0_i32_0 = arith.constant 0 : i32
    %c0_i32_1 = arith.constant 0 : i32
    return %c0_i32, %c0_i32_0 : i32, i32
  }
  func.func @transform_4(%arg0: i32) -> (i32, i32) {
    %c0_i32 = arith.constant 0 : i32
    %c0_i32_0 = arith.constant 0 : i32
    %c0_i32_1 = arith.constant 0 : i32
    return %c0_i32, %c0_i32_0 : i32, i32
  }
  func.func @transform_5(%arg0: i32) -> (i32, i32) {
    %c0_i32 = arith.constant 0 : i32
    %c0_i32_0 = arith.constant 0 : i32
    return %arg0, %c0_i32 : i32, i32
  }
}

</mosaic_0001>

<bundles_post_ra>
// kernel: ffn_forward.1
= control target key start
LH: loop header
LB: loop body
LE: loop exit
PB: predicated region body
PF: predicated region fallthrough
CT: control target
= control target key end

     0   :  { %s542_s1 = inlined_call_operand.vmem [shape: f32[128,128], index: 1, kind: input, shape index: {}]   ;;  %s543_s0 = inlined_call_operand.vmem [shape: f32[16,128], index: 0, kind: input, shape index: {}]   ;;  %s544_s3 = inlined_call_operand.vmem [shape: f32[128,128], index: 3, kind: input, shape index: {}]   ;;  %s545_s2 = inlined_call_operand.vmem [shape: f32[1,128], index: 2, kind: input, shape index: {}]   ;;  %s546_s4 = inlined_call_operand.vmem [shape: f32[1,128], index: 4, kind: input, shape index: {}]   ;;  %s547_s5 = inlined_call_operand.vmem [shape: f32[16,128], index: 5, kind: output, shape index: {}]  }
   0x1   :  { %v22_v0 = vld [vmem:[%s542_s1] sm:$0xff]  ;;  %v23_v1 = vld [vmem:[%s542_s1 + $0x8] sm:$0xff]  ;;  %v24_v2 = vld [vmem:[%s542_s1 + $0x10] sm:$0xff] }
   0x2   :  { %v334_v3 = vpack.c.bf16 %v23_v1, %v22_v0  ;;  %v25_v4 = vld [vmem:[%s542_s1 + $0x18] sm:$0xff]  ;;  %v26_v6 = vld [vmem:[%s542_s1 + $0x20] sm:$0xff]  ;;  %v27_v7 = vld [vmem:[%s542_s1 + $0x28] sm:$0xff] }
   0x3   :  { %v338_v5 = vpack.c.bf16 %v25_v4, %v24_v2  ;;  %v342_v8 = vpack.c.bf16 %v27_v7, %v26_v6  ;;  %v28_v9 = vld [vmem:[%s542_s1 + $0x30] sm:$0xff]  ;;  %v29_v10 = vld [vmem:[%s542_s1 + $0x38] sm:$0xff]  ;;  %v20_v11 = vld [vmem:[%s543_s0] sm:$0xff] }
   0x4   :  { %335 = vmatprep.subr.bf16.mxu0 %v334_v3  ;;  %296 = vmatprep.mubr.f32.mxu0 %v20_v11  ;;  %v122_v12 = vld [vmem:[%s544_s3] sm:$0xff]  ;;  %v123_v13 = vld [vmem:[%s544_s3 + $0x8] sm:$0xff]  ;;  %v124_v14 = vld [vmem:[%s544_s3 + $0x10] sm:$0xff]  ;;  %v346_v20 = vpack.c.bf16 %v29_v10, %v28_v9 }
   0x5   :  { %337 = vmatpush3.bf16.msra.mxu0 %v334_v3  ;;  %v366_v15 = vpack.c.bf16 %v123_v13, %v122_v12  ;;  %v125_v16 = vld [vmem:[%s544_s3 + $0x18] sm:$0xff]  ;;  %v126_v18 = vld [vmem:[%s544_s3 + $0x20] sm:$0xff]  ;;  %v127_v19 = vld [vmem:[%s544_s3 + $0x28] sm:$0xff] }
   0x6   :  { %339 = vmatprep.subr.bf16.mxu0 %v338_v5  ;;  %v370_v17 = vpack.c.bf16 %v125_v16, %v124_v14  ;;  %v30_v21 = vld [vmem:[%s542_s1 + $0x40] sm:$0xff]  ;;  %v31_v22 = vld [vmem:[%s542_s1 + $0x48] sm:$0xff]  ;;  %v374_v23 = vpack.c.bf16 %v127_v19, %v126_v18  ;;  %v128_v24 = vld [vmem:[%s544_s3 + $0x30] sm:$0xff] }
   0x7   :  { %367 = vmatprep.subr.bf16.mxu1 %v366_v15  ;;  %v129_v25 = vld [vmem:[%s544_s3 + $0x38] sm:$0xff]  ;;  %v350_v26 = vpack.c.bf16 %v31_v22, %v30_v21  ;;  %v32_v27 = vld [vmem:[%s542_s1 + $0x50] sm:$0xff]  ;;  %v130_v30 = vld [vmem:[%s544_s3 + $0x40] sm:$0xff] }
   0x8   :  { %369 = vmatpush3.bf16.msra.mxu1 %v366_v15  ;;  %v33_v28 = vld [vmem:[%s542_s1 + $0x58] sm:$0xff]  ;;  %v378_v29 = vpack.c.bf16 %v129_v25, %v128_v24  ;;  %v131_v31 = vld [vmem:[%s544_s3 + $0x48] sm:$0xff]  ;;  %v34_v33 = vld [vmem:[%s542_s1 + $0x60] sm:$0xff] }
   0x9   :  { %341 = vmatpush3.bf16.msra.mxu0 %v338_v5  ;;  %371 = vmatprep.subr.bf16.mxu1 %v370_v17  ;;  %v354_v32 = vpack.c.bf16 %v33_v28, %v32_v27  ;;  %v35_v34 = vld [vmem:[%s542_s1 + $0x68] sm:$0xff]  ;;  %v382_v35 = vpack.c.bf16 %v131_v31, %v130_v30  ;;  %v132_v36 = vld [vmem:[%s544_s3 + $0x50] sm:$0xff]  ;;  %v133_v37 = vld [vmem:[%s544_s3 + $0x58] sm:$0xff] }
   0xa   :  { %343 = vmatprep.subr.bf16.mxu0 %v342_v8  ;;  %v358_v38 = vpack.c.bf16 %v35_v34, %v34_v33  ;;  %v36_v39 = vld [vmem:[%s542_s1 + $0x70] sm:$0xff]  ;;  %v37_v40 = vld [vmem:[%s542_s1 + $0x78] sm:$0xff]  ;;  %v386_v41 = vpack.c.bf16 %v133_v37, %v132_v36  ;;  %v134_v42 = vld [vmem:[%s544_s3 + $0x60] sm:$0xff] }
   0xb   :  { %v135_v43 = vld [vmem:[%s544_s3 + $0x68] sm:$0xff]  ;;  %v362_v44 = vpack.c.bf16 %v37_v40, %v36_v39  ;;  %v136_v47 = vld [vmem:[%s544_s3 + $0x70] sm:$0xff]  ;;  %v137_v48 = vld [vmem:[%s544_s3 + $0x78] sm:$0xff] }
   0xc   :  { %373 = vmatpush3.bf16.msra.mxu1 %v370_v17  ;;  %v390_v45 = vpack.c.bf16 %v135_v43, %v134_v42  ;;  %v21_v46 = vld [vmem:[%s543_s0 + $0x8] sm:$0xff]  ;;  %v394_v49 = vpack.c.bf16 %v137_v48, %v136_v47  ;;  %v226_v50 = vld [vmem:[%s545_s2] ss:$0 sm:$0xff] }
   0xd   :  { %345 = vmatpush3.bf16.msra.mxu0 %v342_v8  ;;  %375 = vmatprep.subr.bf16.mxu1 %v374_v23  ;;  %v227_v57 = vld [vmem:[%s546_s4] ss:$0 sm:$0xff] }
   0xe   :  { %347 = vmatprep.subr.bf16.mxu0 %v346_v20 }
  0x10   :  { %377 = vmatpush3.bf16.msra.mxu1 %v374_v23 }
  0x11   :  { %349 = vmatpush3.bf16.msra.mxu0 %v346_v20  ;;  %379 = vmatprep.subr.bf16.mxu1 %v378_v29 }
  0x12   :  { %351 = vmatprep.subr.bf16.mxu0 %v350_v26 }
  0x14   :  { %381 = vmatpush3.bf16.msra.mxu1 %v378_v29 }
  0x15   :  { %353 = vmatpush3.bf16.msra.mxu0 %v350_v26  ;;  %383 = vmatprep.subr.bf16.mxu1 %v382_v35 }
  0x16   :  { %355 = vmatprep.subr.bf16.mxu0 %v354_v32 }
  0x18   :  { %385 = vmatpush3.bf16.msra.mxu1 %v382_v35 }
  0x19   :  { %357 = vmatpush3.bf16.msra.mxu0 %v354_v32  ;;  %387 = vmatprep.subr.bf16.mxu1 %v386_v41 }
  0x1a   :  { %359 = vmatprep.subr.bf16.mxu0 %v358_v38 }
  0x1c   :  { %389 = vmatpush3.bf16.msra.mxu1 %v386_v41 }
  0x1d   :  { %361 = vmatpush3.bf16.msra.mxu0 %v358_v38  ;;  %391 = vmatprep.subr.bf16.mxu1 %v390_v45 }
  0x1e   :  { %363 = vmatprep.subr.bf16.mxu0 %v362_v44 }
  0x20   :  { %393 = vmatpush3.bf16.msra.mxu1 %v390_v45 }
  0x21   :  { %365 = vmatpush3.bf16.msra.mxu0 %v362_v44  ;;  %395 = vmatprep.subr.bf16.mxu1 %v394_v49 }
  0x24   :  { %297 = vmatmul.mubr.f32.vlgmr.msra.gmra.mrb[0].mxu0 %v21_v46  ;;  %397 = vmatpush3.bf16.msra.mxu1 %v394_v49 }
  0xf7   :  { %v298_v51 = vpop.f32.mrb[0].mxu0 }
  0xf8   :  { %v117_v52 = vadd.f32 %v298_v51, %v226_v50  ;;  %v111_v53 = vpop.f32.mrb[1].mxu0 }
  0xf9   :  { %v112_v54 = vadd.f32 %v226_v50, %v111_v53 }
  0xfa   :  { %v121_v56 = vmax.f32 %v117_v52, 0.0 }
  0xfb   :  { %v120_v55 = vmax.f32 %v112_v54, 0.0 }
  0xfd   :  { %331 = vmatprep.mubr.f32.mxu1 %v120_v55 }
  0xfe   :  { %332 = vmatmul.mubr.f32.vlgmr.msra.gmra.mrb[0].mxu1 %v121_v56 }
 0x1d1   :  { %v333_v58 = vpop.f32.mrb[0].mxu1 }
 0x1d2   :  { %v217_v59 = vadd.f32 %v333_v58, %v227_v57  ;;  %v211_v60 = vpop.f32.mrb[1].mxu1 }
 0x1d3   :  { %v212_v61 = vadd.f32 %v227_v57, %v211_v60 }
 0x1d4   :  { %221 = vst [vmem:[%s547_s5 + $0x8] sm:$0xff] %v217_v59 }
 0x1d5   :  { %220 = vst [vmem:[%s547_s5] sm:$0xff] %v212_v61 }

</bundles_post_ra>
